<compile_context>
chip_gen: v7x
topology: tpu7x:2x2x1
jax: 0.10.0
libtpu: 0.0.40
codegen_flags: <defaults>
</compile_context>

<pallas_src>
import functools

import jax
import jax.numpy as jnp
from jax import lax
from jax.experimental import pallas as pl
from jax.experimental.pallas import tpu as pltpu

GAMMA = 2.0
ALPHA = 0.25
LOSS_WEIGHT = 1.0

TILE_ROWS = 2048          # (2048,128) f32 block = 1 MiB -> ~85% of HBM roofline (measured v6e)
LANES = 128
NUM_PARTS_DEFAULT = 2     # safe fallback: correct on 1-TC chips, shards across TCs on v7x


def _num_tensorcores() -> int:
    """Best-effort TensorCores per chip (2 on v7x, 1 on v5e/v6e); falls back to 2 (always
    correct -- duplicated clamped blocks are skipped in-kernel)."""
    try:
        info = pltpu.get_tpu_info()
        for name in ("num_cores", "core_count", "num_tensorcores", "tensor_core_count"):
            v = getattr(info, name, None)
            if isinstance(v, int) and 1 <= v <= 8:
                return min(int(v), 2)
    except Exception:
        pass
    return NUM_PARTS_DEFAULT


def _focal_loss_kernel(yhat_ref, y_ref, out_ref, *, gamma, alpha, scale,
                       full_rows, rem, row_blocks, blocks_per_part, tile_rows,
                       needs_tail_mask, has_dup_blocks):
    c = pl.program_id(0)
    i = pl.program_id(1)
    blk = c * blocks_per_part + i                     # logical (unclamped) block id

    # Output block (c, 0) is revisited across the "arbitrary" axis -> lives in VMEM
    # and acts as a lane/sublane-parallel (8,128) accumulator.
    @pl.when(i == 0)
    def _():
        out_ref[...] = jnp.zeros_like(out_ref)

    def compute_block():
        x = yhat_ref[...].astype(jnp.float32)
        t = y_ref[...].astype(jnp.float32)

        # One shared exp(-|x|) feeds both the sigmoid and the stable BCE-with-logits.
        e = jnp.exp(-jnp.abs(x))
        inv = 1.0 / (1.0 + e)
        p = jnp.where(x >= 0.0, inv, e * inv)                 # sigmoid(x)
        bce = jnp.maximum(x, 0.0) - x * t + jnp.log1p(e)

        # pt = (1-p)*t + p*(1-t)  ==  p + t - 2*p*t
        pt = p + t - 2.0 * (p * t)
        if gamma == 2.0:                                      # default path: no pow
            mod = pt * pt
        elif gamma == 1.0:
            mod = pt
        elif gamma == 0.0:
            mod = jnp.ones_like(pt)
        else:
            mod = pt ** gamma                                 # non-integer gamma fallback
        # alpha*t + (1-alpha)*(1-t)  ==  (1-alpha) + (2*alpha-1)*t
        aw = (1.0 - alpha) + (2.0 * alpha - 1.0) * t
        return bce * (aw * mod)

    def accumulate(loss):
        # Pure-VPU partial reduction: (tile_rows,128) -> (8,128) by summing (8,128) slabs.
        out_ref[...] += loss.reshape(tile_rows // 8, 8, LANES).sum(axis=0)

    def tail_mask(loss):
        # Row-granular mask (no element-index int32 overflow): zero rows >= full_rows and,
        # on the single partial row, lanes >= rem. MUST stay a select (OOB data may be NaN).
        row_ids = blk * tile_rows + lax.broadcasted_iota(
            jnp.int32, (tile_rows, LANES), 0)
        valid = row_ids < full_rows
        if rem:
            lane_ids = lax.broadcasted_iota(jnp.int32, (tile_rows, LANES), 1)
            valid = valid | ((row_ids == full_rows) & (lane_ids < rem))
        return jnp.where(valid, loss, 0.0)

    if needs_tail_mask:
        # Only the last logical block pays the iota/compare/select cost; duplicated
        # (clamped) blocks from the core split fall in neither branch -> skipped.
        @pl.when(blk == row_blocks - 1)
        def _():
            accumulate(tail_mask(compute_block()))

        @pl.when(blk < row_blocks - 1)
        def _():
            accumulate(compute_block())
    elif has_dup_blocks:
        @pl.when(blk < row_blocks)
        def _():
            accumulate(compute_block())
    else:
        accumulate(compute_block())

    @pl.when(i == pl.num_programs(1) - 1)
    def _():
        # reduction='mean' over every element, scaled by loss_weight.
        out_ref[...] = out_ref[...] * scale


def focal_loss(y_hat, y, gamma=GAMMA, alpha=ALPHA, loss_weight=LOSS_WEIGHT):
    """Pallas sigmoid focal loss, reduction='mean'. y_hat/y: any shape (N, *)."""
    assert y_hat.shape == y.shape, "`pred` and `target` should be in the same shape."
    total = int(y_hat.size)
    # TODO(synk): 'none'/'sum' reductions, sample-wise `weight` and `avg_factor` paths are
    # not wired here (the module's default forward uses weight=None, avg_factor=None).

    pred = y_hat.reshape(-1)                   # row-major flatten: free (no copy) in XLA
    targ = y.reshape(-1)
    if not jnp.issubdtype(targ.dtype, jnp.floating):
        # 0/1 integer / bool labels are exactly representable in bf16 -> fewer HBM bytes
        # on the bandwidth-bound v5e/v6e. Float targets pass through in native dtype.
        targ = targ.astype(jnp.bfloat16)

    # Lane-dense 2-D slab. Only pad (with zeros, masked exactly in-kernel) when the total
    # is not already a multiple of 128 — for typical NCHW inputs this branch never runs.
    rem = total % LANES
    if rem:
        pad = LANES - rem
        pred = jnp.pad(pred, (0, pad))
        targ = jnp.pad(targ, (0, pad))
    rows = pred.shape[0] // LANES
    x2d = pred.reshape(rows, LANES)
    y2d = targ.reshape(rows, LANES)

    # 1 MiB f32 blocks; shrink (multiple of 32 sublanes: valid for f32/bf16/int8 tiling)
    # for small inputs so we don't DMA/compute a mostly out-of-bounds block.
    tile_rows = min(TILE_ROWS, -(-rows // 32) * 32)

    row_blocks = -(-rows // tile_rows)                 # cdiv
    num_parts = _num_tensorcores()
    blocks_per_part = -(-row_blocks // num_parts)      # cdiv
    grid = (num_parts, blocks_per_part)

    full_rows = total // LANES                         # complete rows of real data
    needs_tail_mask = (rem != 0) or (rows % tile_rows != 0)
    has_dup_blocks = num_parts * blocks_per_part > row_blocks

    def in_map(c, i):
        # Clamp so the DMA never targets a fully out-of-range block; the kernel skips
        # duplicated blocks (logical blk >= row_blocks) and masks the partial tail block.
        return (jnp.minimum(c * blocks_per_part + i, row_blocks - 1), 0)

    kernel = functools.partial(
        _focal_loss_kernel,
        gamma=float(gamma),
        alpha=float(alpha),
        scale=float(loss_weight) / float(total),
        full_rows=full_rows,
        rem=rem,
        row_blocks=row_blocks,
        blocks_per_part=blocks_per_part,
        tile_rows=tile_rows,
        needs_tail_mask=needs_tail_mask,
        has_dup_blocks=has_dup_blocks,
    )

    cost = pl.CostEstimate(
        flops=int(25 * total),
        transcendentals=int(2 * total),                # exp + log1p per element
        bytes_accessed=int(x2d.size * x2d.dtype.itemsize
                           + y2d.size * y2d.dtype.itemsize
                           + num_parts * 8 * LANES * 4),
    )

    partials = pl.pallas_call(
        kernel,
        out_shape=jax.ShapeDtypeStruct((num_parts * 8, LANES), jnp.float32),
        grid_spec=pltpu.PrefetchScalarGridSpec(
            num_scalar_prefetch=0,
            grid=grid,
            in_specs=[
                pl.BlockSpec((tile_rows, LANES), in_map),
                pl.BlockSpec((tile_rows, LANES), in_map),
            ],
            out_specs=pl.BlockSpec((8, LANES), lambda c, i: (c, 0)),
        ),
        compiler_params=pltpu.CompilerParams(
            dimension_semantics=("parallel", "arbitrary"),
        ),
        cost_estimate=cost,
    )(x2d, y2d)

    # Single final cross-lane reduction of the already-scaled per-core partials.
    return jnp.sum(partials)


def _reference_focal_loss(y_hat, y, gamma=GAMMA, alpha=ALPHA, loss_weight=LOSS_WEIGHT):
    x = y_hat.astype(jnp.float32)
    t = y.astype(jnp.float32)
    p = jax.nn.sigmoid(x)
    pt = (1 - p) * t + p * (1 - t)
    fw = (alpha * t + (1 - alpha) * (1 - t)) * pt ** gamma
    bce = jnp.maximum(x, 0.0) - x * t + jnp.log1p(jnp.exp(-jnp.abs(x)))
    return loss_weight * jnp.mean(bce * fw)


if __name__ == "__main__":
    key = jax.random.PRNGKey(0)
    k1, k2 = jax.random.split(key)
    # NCHW-shaped prediction / target, as the PyTorch module would receive.
    N, C, H, W = 2, 4, 16, 16
    y_hat = jax.random.normal(k1, (N, C, H, W), dtype=jnp.float32) * 2.0
    y = (jax.random.uniform(k2, (N, C, H, W)) > 0.5).astype(jnp.float32)

    loss = focal_loss(y_hat, y)
    loss = jax.block_until_ready(loss)

    ref = _reference_focal_loss(y_hat, y)
    assert jnp.allclose(loss, ref, rtol=1e-5, atol=1e-6), (loss, ref)
    print("KERNEL_OK")
</pallas_src>

<mosaic_0001>
module attributes {stable_mosaic.version = 11 : i64} {
  func.func @_focal_loss_kernel(%arg0: i32, %arg1: i32, %arg2: memref<32x128xf32, #tpu.memory_space<vmem>>, %arg3: memref<32x128xf32, #tpu.memory_space<vmem>>, %arg4: memref<8x128xf32, #tpu.memory_space<vmem>>) attributes {dimension_semantics = [#tpu.dimension_semantics<parallel>, #tpu.dimension_semantics<arbitrary>], iteration_bounds = array<i64: 2, 1>, scalar_prefetch = 0 : i64, scratch_operands = 0 : i64, tpu.core_type = #tpu.core_type<tc>, window_params = [{transform_indices = @transform_0, window_bounds = array<i64: 32, 128>}, {transform_indices = @transform_1, window_bounds = array<i64: 32, 128>}, {transform_indices = @transform_2, window_bounds = array<i64: 8, 128>}]} {
    %c1_i32 = arith.constant 1 : i32
    %0 = arith.muli %arg0, %c1_i32 : i32
    %1 = arith.addi %0, %arg1 : i32
    %c0_i32 = arith.constant 0 : i32
    %2 = arith.cmpi eq, %arg1, %c0_i32 : i32
    %3 = arith.extui %2 : i1 to i32
    %c0_i32_0 = arith.constant 0 : i32
    %4 = arith.cmpi ne, %3, %c0_i32_0 : i32
    scf.if %4 {
      %cst = arith.constant 0.000000e+00 : f32
      %14 = vector.broadcast %cst : f32 to vector<8x128xf32>
      %c0 = arith.constant 0 : index
      %c0_7 = arith.constant 0 : index
      %15 = vector.load %arg4[%c0, %c0_7] : memref<8x128xf32, #tpu.memory_space<vmem>>, vector<8x128xf32>
      tpu.vector_store %arg4[%c0, %c0_7], %14 {strides = array<i32>} : memref<8x128xf32, #tpu.memory_space<vmem>>, vector<8x128xf32>,
    } else {
    }
    %c0_i32_1 = arith.constant 0 : i32
    %5 = arith.cmpi eq, %1, %c0_i32_1 : i32
    %6 = arith.extui %5 : i1 to i32
    %c0_i32_2 = arith.constant 0 : i32
    %7 = arith.cmpi ne, %6, %c0_i32_2 : i32
    scf.if %7 {
      %c0 = arith.constant 0 : index
      %c0_7 = arith.constant 0 : index
      %14 = vector.load %arg2[%c0, %c0_7] : memref<32x128xf32, #tpu.memory_space<vmem>>, vector<32x128xf32>
      %c0_8 = arith.constant 0 : index
      %c0_9 = arith.constant 0 : index
      %15 = vector.load %arg3[%c0_8, %c0_9] : memref<32x128xf32, #tpu.memory_space<vmem>>, vector<32x128xf32>
      %16 = math.absf %14 : vector<32x128xf32>
      %cst = arith.constant 0.000000e+00 : f32
      %17 = vector.broadcast %cst : f32 to vector<32x128xf32>
      %18 = arith.subf %17, %16 : vector<32x128xf32>
      %19 = math.exp %18 : vector<32x128xf32>
      %cst_10 = arith.constant 1.000000e+00 : f32
      %20 = vector.broadcast %cst_10 : f32 to vector<32x128xf32>
      %21 = arith.addf %20, %19 : vector<32x128xf32>
      %cst_11 = arith.constant 1.000000e+00 : f32
      %22 = vector.broadcast %cst_11 : f32 to vector<32x128xf32>
      %23 = arith.divf %22, %21 : vector<32x128xf32>
      %cst_12 = arith.constant 0.000000e+00 : f32
      %24 = vector.broadcast %cst_12 : f32 to vector<32x128xf32>
      %25 = arith.cmpf oge, %14, %24 : vector<32x128xf32>
      %26 = arith.mulf %19, %23 : vector<32x128xf32>
      %27 = arith.select %25, %23, %26 : vector<32x128xi1>, vector<32x128xf32>
      %cst_13 = arith.constant 0.000000e+00 : f32
      %28 = vector.broadcast %cst_13 : f32 to vector<32x128xf32>
      %29 = arith.maximumf %14, %28 : vector<32x128xf32>
      %30 = arith.mulf %14, %15 : vector<32x128xf32>
      %31 = arith.subf %29, %30 : vector<32x128xf32>
      %32 = math.log1p %19 : vector<32x128xf32>
      %33 = arith.addf %31, %32 : vector<32x128xf32>
      %34 = arith.addf %27, %15 : vector<32x128xf32>
      %35 = arith.mulf %27, %15 : vector<32x128xf32>
      %cst_14 = arith.constant 2.000000e+00 : f32
      %36 = vector.broadcast %cst_14 : f32 to vector<32x128xf32>
      %37 = arith.mulf %36, %35 : vector<32x128xf32>
      %38 = arith.subf %34, %37 : vector<32x128xf32>
      %39 = arith.mulf %38, %38 : vector<32x128xf32>
      %cst_15 = arith.constant -5.000000e-01 : f32
      %40 = vector.broadcast %cst_15 : f32 to vector<32x128xf32>
      %41 = arith.mulf %40, %15 : vector<32x128xf32>
      %cst_16 = arith.constant 7.500000e-01 : f32
      %42 = vector.broadcast %cst_16 : f32 to vector<32x128xf32>
      %43 = arith.addf %42, %41 : vector<32x128xf32>
      %44 = arith.mulf %43, %39 : vector<32x128xf32>
      %45 = arith.mulf %33, %44 : vector<32x128xf32>
      %c32_i32 = arith.constant 32 : i32
      %46 = arith.muli %1, %c32_i32 : i32
      %47 = tpu.iota {dimensions = array<i32: 0>} : vector<32x128xi32>
      %48 = vector.broadcast %46 : i32 to vector<32x128xi32>
      %49 = arith.addi %48, %47 : vector<32x128xi32>
      %c16_i32 = arith.constant 16 : i32
      %50 = vector.broadcast %c16_i32 : i32 to vector<32x128xi32>
      %51 = arith.cmpi slt, %49, %50 : vector<32x128xi32>
      %cst_17 = arith.constant 0.000000e+00 : f32
      %52 = vector.broadcast %cst_17 : f32 to vector<32x128xf32>
      %53 = arith.select %51, %45, %52 : vector<32x128xi1>, vector<32x128xf32>
      %c0_18 = arith.constant 0 : index
      %c0_19 = arith.constant 0 : index
      %54 = vector.load %arg4[%c0_18, %c0_19] : memref<8x128xf32, #tpu.memory_space<vmem>>, vector<8x128xf32>
      %55 = vector.shape_cast %53 : vector<32x128xf32> to vector<4x8x128xf32>
      %cst_20 = arith.constant dense<0.000000e+00> : vector<8x128xf32>
      %56 = vector.multi_reduction <add>, %55, %cst_20 [0] : vector<4x8x128xf32> to vector<8x128xf32>
      %57 = arith.addf %54, %56 : vector<8x128xf32>
      %c0_21 = arith.constant 0 : index
      %c0_22 = arith.constant 0 : index
      %58 = vector.load %arg4[%c0_21, %c0_22] : memref<8x128xf32, #tpu.memory_space<vmem>>, vector<8x128xf32>
      tpu.vector_store %arg4[%c0_21, %c0_22], %57 {strides = array<i32>} : memref<8x128xf32, #tpu.memory_space<vmem>>, vector<8x128xf32>,
    } else {
    }
    %c0_i32_3 = arith.constant 0 : i32
    %8 = arith.cmpi slt, %1, %c0_i32_3 : i32
    %9 = arith.extui %8 : i1 to i32
    %c0_i32_4 = arith.constant 0 : i32
    %10 = arith.cmpi ne, %9, %c0_i32_4 : i32
    scf.if %10 {
      %c0 = arith.constant 0 : index
      %c0_7 = arith.constant 0 : index
      %14 = vector.load %arg2[%c0, %c0_7] : memref<32x128xf32, #tpu.memory_space<vmem>>, vector<32x128xf32>
      %c0_8 = arith.constant 0 : index
      %c0_9 = arith.constant 0 : index
      %15 = vector.load %arg3[%c0_8, %c0_9] : memref<32x128xf32, #tpu.memory_space<vmem>>, vector<32x128xf32>
      %16 = math.absf %14 : vector<32x128xf32>
      %cst = arith.constant 0.000000e+00 : f32
      %17 = vector.broadcast %cst : f32 to vector<32x128xf32>
      %18 = arith.subf %17, %16 : vector<32x128xf32>
      %19 = math.exp %18 : vector<32x128xf32>
      %cst_10 = arith.constant 1.000000e+00 : f32
      %20 = vector.broadcast %cst_10 : f32 to vector<32x128xf32>
      %21 = arith.addf %20, %19 : vector<32x128xf32>
      %cst_11 = arith.constant 1.000000e+00 : f32
      %22 = vector.broadcast %cst_11 : f32 to vector<32x128xf32>
      %23 = arith.divf %22, %21 : vector<32x128xf32>
      %cst_12 = arith.constant 0.000000e+00 : f32
      %24 = vector.broadcast %cst_12 : f32 to vector<32x128xf32>
      %25 = arith.cmpf oge, %14, %24 : vector<32x128xf32>
      %26 = arith.mulf %19, %23 : vector<32x128xf32>
      %27 = arith.select %25, %23, %26 : vector<32x128xi1>, vector<32x128xf32>
      %cst_13 = arith.constant 0.000000e+00 : f32
      %28 = vector.broadcast %cst_13 : f32 to vector<32x128xf32>
      %29 = arith.maximumf %14, %28 : vector<32x128xf32>
      %30 = arith.mulf %14, %15 : vector<32x128xf32>
      %31 = arith.subf %29, %30 : vector<32x128xf32>
      %32 = math.log1p %19 : vector<32x128xf32>
      %33 = arith.addf %31, %32 : vector<32x128xf32>
      %34 = arith.addf %27, %15 : vector<32x128xf32>
      %35 = arith.mulf %27, %15 : vector<32x128xf32>
      %cst_14 = arith.constant 2.000000e+00 : f32
      %36 = vector.broadcast %cst_14 : f32 to vector<32x128xf32>
      %37 = arith.mulf %36, %35 : vector<32x128xf32>
      %38 = arith.subf %34, %37 : vector<32x128xf32>
      %39 = arith.mulf %38, %38 : vector<32x128xf32>
      %cst_15 = arith.constant -5.000000e-01 : f32
      %40 = vector.broadcast %cst_15 : f32 to vector<32x128xf32>
      %41 = arith.mulf %40, %15 : vector<32x128xf32>
      %cst_16 = arith.constant 7.500000e-01 : f32
      %42 = vector.broadcast %cst_16 : f32 to vector<32x128xf32>
      %43 = arith.addf %42, %41 : vector<32x128xf32>
      %44 = arith.mulf %43, %39 : vector<32x128xf32>
      %45 = arith.mulf %33, %44 : vector<32x128xf32>
      %c0_17 = arith.constant 0 : index
      %c0_18 = arith.constant 0 : index
      %46 = vector.load %arg4[%c0_17, %c0_18] : memref<8x128xf32, #tpu.memory_space<vmem>>, vector<8x128xf32>
      %47 = vector.shape_cast %45 : vector<32x128xf32> to vector<4x8x128xf32>
      %cst_19 = arith.constant dense<0.000000e+00> : vector<8x128xf32>
      %48 = vector.multi_reduction <add>, %47, %cst_19 [0] : vector<4x8x128xf32> to vector<8x128xf32>
      %49 = arith.addf %46, %48 : vector<8x128xf32>
      %c0_20 = arith.constant 0 : index
      %c0_21 = arith.constant 0 : index
      %50 = vector.load %arg4[%c0_20, %c0_21] : memref<8x128xf32, #tpu.memory_space<vmem>>, vector<8x128xf32>
      tpu.vector_store %arg4[%c0_20, %c0_21], %49 {strides = array<i32>} : memref<8x128xf32, #tpu.memory_space<vmem>>, vector<8x128xf32>,
    } else {
    }
    %c0_i32_5 = arith.constant 0 : i32
    %11 = arith.cmpi eq, %arg1, %c0_i32_5 : i32
    %12 = arith.extui %11 : i1 to i32
    %c0_i32_6 = arith.constant 0 : i32
    %13 = arith.cmpi ne, %12, %c0_i32_6 : i32
    scf.if %13 {
      %c0 = arith.constant 0 : index
      %c0_7 = arith.constant 0 : index
      %14 = vector.load %arg4[%c0, %c0_7] : memref<8x128xf32, #tpu.memory_space<vmem>>, vector<8x128xf32>
      %cst = arith.constant 4.8828125E-4 : f32
      %15 = vector.broadcast %cst : f32 to vector<8x128xf32>
      %16 = arith.mulf %14, %15 : vector<8x128xf32>
      %c0_8 = arith.constant 0 : index
      %c0_9 = arith.constant 0 : index
      %17 = vector.load %arg4[%c0_8, %c0_9] : memref<8x128xf32, #tpu.memory_space<vmem>>, vector<8x128xf32>
      tpu.vector_store %arg4[%c0_8, %c0_9], %16 {strides = array<i32>} : memref<8x128xf32, #tpu.memory_space<vmem>>, vector<8x128xf32>,
    } else {
    }
    return
  }
  func.func @transform_0(%arg0: i32, %arg1: i32) -> (i32, i32) {
    %c1_i32 = arith.constant 1 : i32
    %0 = arith.muli %arg0, %c1_i32 : i32
    %1 = arith.addi %0, %arg1 : i32
    %c0_i32 = arith.constant 0 : i32
    %2 = arith.minsi %1, %c0_i32 : i32
    %c0_i32_0 = arith.constant 0 : i32
    %c0_i32_1 = arith.constant 0 : i32
    return %2, %c0_i32_0 : i32, i32
  }
  func.func @transform_1(%arg0: i32, %arg1: i32) -> (i32, i32) {
    %c1_i32 = arith.constant 1 : i32
    %0 = arith.muli %arg0, %c1_i32 : i32
    %1 = arith.addi %0, %arg1 : i32
    %c0_i32 = arith.constant 0 : i32
    %2 = arith.minsi %1, %c0_i32 : i32
    %c0_i32_0 = arith.constant 0 : i32
    %c0_i32_1 = arith.constant 0 : i32
    return %2, %c0_i32_0 : i32, i32
  }
  func.func @transform_2(%arg0: i32, %arg1: i32) -> (i32, i32) {
    %c0_i32 = arith.constant 0 : i32
    %c0_i32_0 = arith.constant 0 : i32
    return %arg0, %c0_i32 : i32, i32
  }
}

</mosaic_0001>

<bundles_post_ra>
// kernel: tpu_custom_call.1
= control target key start
LH: loop header
LB: loop body
LE: loop exit
PB: predicated region body
PF: predicated region fallthrough
CT: control target
= control target key end

     0   :  { %7 = vsyncpa [#allocation3], 0  ;;  %s1500_s0 = inlined_call_operand.hbm [shape: f32[16,128], index: 0, kind: input, shape index: {}]   ;;  %s1501_s1 = inlined_call_operand.hbm [shape: f32[16,128], index: 1, kind: input, shape index: {}]   ;;  %s1502_s2 = inlined_call_operand.hbm [shape: f32[16,128], index: 2, kind: output, shape index: {}]  }
   0x1   :  { %9 = vsyncpa [#allocation3 + $0x1], 0 }
   0x2   :  { %10 = vsyncpa [#allocation6], 0 }
   0x3   :  { %12 = vsyncpa [#allocation6 + $0x1], 0 }
   0x4   :  { %13 = vsyncpa [#allocation4], 0 }
   0x5   :  { %15 = vsyncpa [#allocation4 + $0x1], 0  ;;  %s1047_s9 = smov 0   ;;  %s1049_s10 = smov 0  }
   0x6   :  { %s1051_s11 = smov 0   ;;  %s1053_s12 = smov 0  }
   0x7   :  { %s1055_s13 = smov 0   ;;  %s1057_s14 = smov 0  }
   0x8   :  { %s1059_s15 = smov 0   ;;  %s1061_s16 = smov 0  }
   0x9 LB: > { %s690_s17 = sadd.s32 4294967295, %s1022_s16   ;;  %s691_s18 = sadd.s32 4294967294, %s1022_s16   ;;  %s1022_s16 = sphi %s1061_s16, %s21_s16   ;;  %s1018_s15 = sphi %s1059_s15, %s1530_s15   ;;  %s1014_s14 = sphi %s1057_s14, %s1529_s14   ;;  %s1010_s13 = sphi %s1055_s13, %s1490_s13   ;;  %s1006_s12 = sphi %s1053_s12, %s1528_s12   ;;  %s1002_s11 = sphi %s1051_s11, %s1527_s11   ;;  %s998_s10 = sphi %s1049_s10, %s1526_s10   ;;  %s994_s9 = sphi %s1047_s9, %s1525_s9  }
   0xa   : > { %s33_s19 = sadd.s32 1, %s1018_s15  ;;  %p991_p1 = scmp.ne.s32.totalorder %s1010_s13, 0 }
   0xb   : > { %p35_p0 = scmp.ge.s32.totalorder %s33_s19, 2  ;;  %p54_p2 = scmp.eq.s32.totalorder %s1022_s16, 0 }
   0xc   : > { %p59_p3 = scmp.ne.s32.totalorder %s1010_s13, %s1006_s12  ;;  %p60_p5 = scmp.eq.s32.totalorder %s690_s17, 0 }
   0xd   : > { %s1532_s19 = smov (%p35_p0, %s33_s19), 0  ;;  %p1093_p4 = por %p991_p1, %p54_p2 }
   0xe   : > { %p1097_p6 = por %p60_p5, %p59_p3  ;;  %s101_s22 = ssub.s32 %s1018_s15, %s1532_s19 }
   0xf   : > { %p102_p7 = scmp.eq.s32.totalorder %s101_s22, 0  ;;  %s104_s23 = sadd.s32 1, %s1002_s11 }
  0x10   : > { %p114_p8 = scmp.ne.s32.totalorder %s1002_s11, %s998_s10  ;;  %p115_p9 = scmp.eq.s32.totalorder %s690_s17, 1 }
  0x11   : > { %s1105_s24 = scalar_select %p102_p7, %s1002_s11, %s104_s23  }
  0x12   : > { %p120_p10 = scmp.ne.s32.totalorder %s998_s10, %s994_s9  ;;  %p121_p11 = scmp.eq.s32.totalorder %s691_s18, 1 }
  0x13   : > { %p1111_p12 = por %p115_p9, %p114_p8  ;;  %p1503_p0 = scmp.ge.s32.totalorder %s1022_s16, 2 }
  0x14   : > { %p1115_p13 = por %p121_p11, %p120_p10 }
  0x15   : > { %137 = sbr.rel (%p1503_p0) target bundleno = 82 (0x52), region = 16 }
  0x1c   : > { %140 = sbr.rel (!%p1093_p4) target bundleno = 55 (0x37), region = 20 }
  0x23   : > { %154 = vsyncadd [#allocation3], 256  ;;  %s1024_s27 = smov [#allocation2]   ;;  %s855_s3 = scalar_lea.hbm %s1500_s0, 256 }
  0x24   : > { %s159_s28 = sshll.u32 %s1024_s27, 4  ;;  %p856_p1 = scmp.ne.s32.totalorder %s1500_s0, %s855_s3  ;;  %s160_s28 = int_to_ptr.vmem [resolvable:$true] %s159_s28 }
  0x25   : > { %p861_p2 = scmp.lt.u32.totalorder %s855_s3, %s855_s3  ;;  %p863_p3 = scmp.lt.u32.totalorder %s855_s3, %s1500_s0 }
  0x27   : > { %p864_p5 = por %p863_p3, %p861_p2 }
  0x29   : > { %p865_p7 = pnand %p864_p5, %p856_p1 }
  0x2b   : > { %868 = shalt.err (!%p865_p7)
}
  0x2c   : > { %s869_s8 = scalar_lea.vmem %s160_s28, 256  ;;  %s875_s12 = scalar_lea.vmem %s160_s28, 1024 }
  0x2d   : > { %p870_p8 = scmp.ne.s32.totalorder %s160_s28, %s869_s8  ;;  %p876_p9 = scmp.lt.s32.totalorder %s160_s28, %s160_s28 }
  0x2e   : > { %p877_p10 = scmp.lt.s32.totalorder %s875_s12, %s869_s8 }
  0x30   : > { %p878_p11 = por %p877_p10, %p876_p9 }
  0x32   : > { %p879_p0 = pnand %p878_p11, %p870_p8 }
  0x34   : > { %882 = shalt.err (!%p879_p0)
}
  0x35   : > { %s1025_s17 = smov 128   ;;  %s1026_s18 = smov 8  }
  0x36   : > { %165 = dma.hbm_to_vmem [thread:$0]  %s1500_s0, 256, %s160_s28, [#allocation3], %s1025_s17, %s1025_s17, %s1026_s18  }
  0x37 PF: > { %168 = sbr.rel (!%p1093_p4) target bundleno = 82 (0x52), region = 24 }
  0x3e   : > { %182 = vsyncadd [#allocation6], 256  ;;  %s1027_s27 = smov [#allocation5]   ;;  %s883_s4 = scalar_lea.hbm %s1501_s1, 256 }
  0x3f   : > { %s187_s29 = sshll.u32 %s1027_s27, 4  ;;  %p884_p0 = scmp.ne.s32.totalorder %s1501_s1, %s883_s4  ;;  %s188_s29 = int_to_ptr.vmem [resolvable:$true] %s187_s29 }
  0x40   : > { %p889_p1 = scmp.lt.u32.totalorder %s883_s4, %s883_s4  ;;  %p891_p2 = scmp.lt.u32.totalorder %s883_s4, %s1501_s1 }
  0x42   : > { %p892_p3 = por %p891_p2, %p889_p1 }
  0x44   : > { %p893_p5 = pnand %p892_p3, %p884_p0 }
  0x46   : > { %896 = shalt.err (!%p893_p5)
}
  0x47   : > { %s897_s20 = scalar_lea.vmem %s188_s29, 256  ;;  %s903_s28 = scalar_lea.vmem %s188_s29, 1024 }
  0x48   : > { %p898_p4 = scmp.ne.s32.totalorder %s188_s29, %s897_s20  ;;  %p904_p7 = scmp.lt.s32.totalorder %s188_s29, %s188_s29 }
  0x49   : > { %p905_p8 = scmp.lt.s32.totalorder %s903_s28, %s897_s20 }
  0x4b   : > { %p906_p9 = por %p905_p8, %p904_p7 }
  0x4d   : > { %p907_p10 = pnand %p906_p9, %p898_p4 }
  0x4f   : > { %910 = shalt.err (!%p907_p10)
}
  0x50   : > { %s1028_s12 = smov 128   ;;  %s1029_s17 = smov 8  }
  0x51   : > { %193 = dma.hbm_to_vmem [thread:$0]  %s1501_s1, 256, %s188_s29, [#allocation6], %s1028_s12, %s1028_s12, %s1029_s17  }
  0x52 PF: > { %p708_p11 = scmp.ge.s32.totalorder %s1022_s16, 1  ;;  %p195_p0 = scmp.lt.s32.totalorder %s1022_s16, 3 }
  0x54   : > { %p196_p1 = pnand %p708_p11, %p195_p0 }
  0x55   : > { %s201_s23 = sand.u32 (!%p196_p1), 1, %s1010_s13  }
  0x56   : > { %199 = sbr.rel (%p196_p1) target bundleno = 237 (0xed), region = 28  ;;  %s709_s27 = sshll.u32 (!%p196_p1), %s201_s23, 5 }
  0x57   : > { %s202_s30 = scalar_lea.sflag (!%p196_p1), [#allocation3], %s201_s23  ;;  %s1153_s3 = scalar_lea.vmem (!%p196_p1), [#allocation2], %s709_s27 }
  0x5d   : > { %976 = dma.done.wait (%p1097_p6), %s202_s30, 512  }
  0x5e   : > { %978 = vsyncadd (%p1097_p6), %s202_s30, 4294966784  ;;  %s211_s29 = scalar_lea.sflag [#allocation6], %s201_s23  ;;  %s1159_s4 = scalar_lea.vmem [#allocation5], %s709_s27 }
  0x5f   : > { %980 = dma.done.wait (%p1097_p6), %s211_s29, 512  }
  0x60   : > { %982 = vsyncadd (%p1097_p6), %s211_s29, 4294966784  ;;  %s237_s5 = sand.u32 1, %s998_s10   ;;  %v1030_v0 = vmov 0.0   ;;  %p712_p2 = scmp.ne.s32.totalorder %s1014_s14, 0 }
  0x61   : > { %s711_s6 = sshll.u32 %s237_s5, 3  ;;  %v1173_v1 = vld [vmem:[%s1153_s3] sm:$0xff] (!%p712_p2)  ;;  %v1176_v2 = vld [vmem:[%s1153_s3 + $0x8] sm:$0xff] (!%p712_p2)  ;;  %v1179_v3 = vld [vmem:[%s1153_s3 + $0x10] sm:$0xff] (!%p712_p2)  ;;  %s713_s21 = sshll.u32 (!%p712_p2), %s1014_s14, 5  ;;  %v399_v31 = vlaneseq (!%p712_p2) }
  0x62   : > { %s1168_s7 = scalar_lea.vmem [#allocation7], %s711_s6  ;;  %261 = sbr.rel (%p712_p2) target bundleno = 155 (0x9b), region = 44  ;;  %v1182_v4 = vld [vmem:[%s1153_s3 + $0x18] sm:$0xff] (!%p712_p2)  ;;  %v270_v5 = vand.u32 (!%p712_p2), 2147483647, %v1173_v1  ;;  %v1193_v19 = vld [vmem:[%s1159_s4] sm:$0xff] (!%p712_p2)  ;;  %v1222_v36 = vstv (!%p712_p2), %s713_s21 }
  0x63   : > { %257 = vst [vmem:[%s1168_s7] sm:$0xff] %v1030_v0  ;;  %v271_v6 = vand.u32 (!%p712_p2), 2147483647, %v1176_v2  ;;  %v272_v7 = vand.u32 (!%p712_p2), 2147483647, %v1179_v3  ;;  %v273_v8 = vand.u32 (!%p712_p2), 2147483647, %v1182_v4  ;;  %v314_v25 = vmul.f32 (!%p712_p2), %v1193_v19, %v1173_v1 }
  0x64   : > { %v274_v9 = vsub.f32 (!%p712_p2), 0.0, %v270_v5  ;;  %v1199_v22 = vld [vmem:[%s1159_s4 + $0x8] sm:$0xff] (!%p712_p2)  ;;  %v310_v24 = vmax.f32 (!%p712_p2), %v1173_v1, 0.0  ;;  %v311_v28 = vmax.f32 (!%p712_p2), %v1176_v2, 0.0  ;;  %v1214_v32 = vld [vmem:[%s1159_s4 + $0x10] sm:$0xff] (!%p712_p2)  ;;  %v1217_v33 = vld [vmem:[%s1159_s4 + $0x18] sm:$0xff] (!%p712_p2) }
  0x65   : > { %v275_v10 = vsub.f32 (!%p712_p2), 0.0, %v271_v6  ;;  %v276_v11 = vsub.f32 (!%p712_p2), 0.0, %v272_v7  ;;  %v277_v12 = vsub.f32 (!%p712_p2), 0.0, %v273_v8  ;;  %v315_v29 = vmul.f32 (!%p712_p2), %v1199_v22, %v1176_v2 }
  0x66   : > { %v278_v13 = vmul.f32 (!%p712_p2), 1.442695, %v274_v9  ;;  %vm298_vm0 = vcmp.ge.f32.partialorder (!%p712_p2), %v1173_v1, 0.0  ;;  %v312_v34 = vmax.f32 (!%p712_p2), %v1179_v3, 0.0  ;;  %v313_v35 = vmax.f32 (!%p712_p2), %v1182_v4, 0.0 }
  0x67   : > { %v280_v14 = vmul.f32 (!%p712_p2), 1.442695, %v275_v10  ;;  %v282_v15 = vmul.f32 (!%p712_p2), 1.442695, %v276_v11  ;;  %v284_v16 = vmul.f32 (!%p712_p2), 1.442695, %v277_v12  ;;  %v316_v37 = vmul.f32 (!%p712_p2), %v1214_v32, %v1179_v3 }
  0x68   : > { %807 = vpow2.f32 (!%p712_p2), %v278_v13  ;;  %vm299_vm1 = vcmp.ge.f32.partialorder (!%p712_p2), %v1176_v2, 0.0  ;;  %v317_v38 = vmul.f32 (!%p712_p2), %v1217_v33, %v1182_v4  ;;  %v1229_v39 = vsub.f32 (!%p712_p2), %v310_v24, %v314_v25 }
  0x69   : > { %809 = vpow2.f32 %v280_v14  ;;  %vm300_vm2 = vcmp.ge.f32.partialorder %v1179_v3, 0.0  ;;  %v1232_v40 = vsub.f32 %v311_v28, %v315_v29  ;;  %vm301_vm3 = vcmp.ge.f32.partialorder %v1182_v4, 0.0 }
  0x6a   : > { %811 = vpow2.f32 %v282_v15  ;;  %v382_v43 = vmul.f32 -0.5, %v1193_v19  ;;  %v383_v44 = vmul.f32 -0.5, %v1199_v22  ;;  %v384_v45 = vmul.f32 -0.5, %v1214_v32 }
  0x6b   : > { %813 = vpow2.f32 %v284_v16  ;;  %v385_v47 = vmul.f32 -0.5, %v1217_v33  ;;  %v400_v48 = vshrl.u32 %v399_v31, 7  ;;  %v1242_v49 = vsub.f32 %v312_v34, %v316_v37 }
  0x6c   : > { %v1246_v52 = vsub.f32 %v313_v35, %v317_v38  ;;  %v1250_v57 = vadd.f32 0.75, %v382_v43  ;;  %v1252_v58 = vadd.f32 0.75, %v383_v44  ;;  %v1254_v59 = vadd.f32 0.75, %v384_v45 }
  0x6d   : > { %v1256_v62 = vadd.f32 0.75, %v385_v47  ;;  %v401_v63 = vadd.s32 8, %v400_v48  ;;  %v402_v0 = vadd.s32 16, %v400_v48  ;;  %v403_v9 = vadd.s32 24, %v400_v48 }
  0x72   : > { %v1188_v17 = vpop.eup %807 }
  0x73   : > { %v1190_v18 = vpop.eup %809  ;;  %v286_v20 = vadd.f32 1.0, %v1188_v17  ;;  %v325_v41 = vmul.f32 -0.5, %v1188_v17  ;;  %v328_v50 = vand.u32 2147483647, %v1188_v17 }
  0x74   : > { %v1196_v21 = vpop.eup %811  ;;  %v287_v23 = vadd.f32 1.0, %v1190_v18  ;;  %v334_v42 = vmul.f32 -0.5, %v1190_v18  ;;  %v337_v55 = vand.u32 2147483647, %v1190_v18 }
  0x75   : > { %v1206_v26 = vpop.eup %813  ;;  %v288_v27 = vadd.f32 1.0, %v1196_v21  ;;  %815 = vrcp.f32 %v286_v20  ;;  %v343_v46 = vmul.f32 -0.5, %v1196_v21  ;;  %v326_v53 = vadd.f32 1.0, %v325_v41 }
  0x76   : > { %v289_v30 = vadd.f32 1.0, %v1206_v26  ;;  %817 = vrcp.f32 %v287_v23  ;;  %v352_v51 = vmul.f32 -0.5, %v1206_v26  ;;  %v335_v54 = vadd.f32 1.0, %v334_v42 }
  0x77   : > { %819 = vrcp.f32 %v288_v27  ;;  %v346_v56 = vand.u32 2147483647, %v1196_v21  ;;  %v344_v61 = vadd.f32 1.0, %v343_v46  ;;  %vm1259_vm4 = vcmp.lt.f32.partialorder %v328_v50, 0.0004427343 }
  0x78   : > { %821 = vrcp.f32 %v289_v30  ;;  %v353_v8 = vadd.f32 1.0, %v352_v51  ;;  %v327_v12 = vmul.f32 %v1188_v17, %v326_v53  ;;  %v336_v13 = vmul.f32 %v1190_v18, %v335_v54 }
  0x79   : > { %823 = vlog2.f32 %v286_v20  ;;  %vm1266_vm5 = vcmp.lt.f32.partialorder %v337_v55, 0.0004427343  ;;  %vm1273_vm6 = vcmp.lt.f32.partialorder %v346_v56, 0.0004427343  ;;  %v355_v24 = vand.u32 2147483647, %v1206_v26 }
  0x7a   : > { %825 = vlog2.f32 %v287_v23  ;;  %v354_v31 = vmul.f32 %v1206_v26, %v353_v8  ;;  %v405_v51 = vadd.s32 %v1222_v36, %v400_v48  ;;  %v407_v48 = vadd.s32 %v1222_v36, %v402_v0 }
  0x7b   : > { %827 = vlog2.f32 %v288_v27  ;;  %v345_v27 = vmul.f32 %v1196_v21, %v344_v61  ;;  %vm1294_vm7 = vcmp.lt.f32.partialorder %v355_v24, 0.0004427343  ;;  %v417_v24 = vld [vmem:[%s1168_s7] sm:$0xff] }
  0x7c   : > { %829 = vlog2.f32 %v289_v30  ;;  %vm409_vm8 = vcmp.lt.s32.totalorder %v405_v51, 16  ;;  %vm411_vm10 = vcmp.lt.s32.totalorder %v407_v48, 16 }
  0x7f   : > { %v816_v60 = vpop.eup %815 }
  0x80   : > { %v818_v5 = vpop.eup %817  ;;  %v302_v6 = vmul.f32 %v816_v60, %v1188_v17 }
  0x81   : > { %v820_v10 = vpop.eup %819  ;;  %v303_v11 = vmul.f32 %v818_v5, %v1190_v18 }
  0x82   : > { %v822_v15 = vpop.eup %821  ;;  %v304_v16 = vmul.f32 %v820_v10, %v1196_v21  ;;  %v306_v20 = vsel %vm298_vm0, %v816_v60, %v302_v6  ;;  %v406_v60 = vadd.s32 %v1222_v36, %v401_v63 }
  0x83   : > { %v824_v25 = vpop.eup %823  ;;  %v305_v17 = vmul.f32 %v822_v15, %v1206_v26  ;;  %v307_v18 = vsel %vm299_vm1, %v818_v5, %v303_v11  ;;  %v366_v28 = vmul.f32 %v306_v20, %v1193_v19  ;;  %v362_v2 = vadd.f32 %v306_v20, %v1193_v19 }
  0x84   : > { %v826_v29 = vpop.eup %825  ;;  %v308_v1 = vsel %vm300_vm2, %v820_v10, %v304_v16  ;;  %v324_v30 = vmul.f32 0.6931472, %v824_v25  ;;  %v367_v34 = vmul.f32 %v307_v18, %v1199_v22  ;;  %v363_v43 = vadd.f32 %v307_v18, %v1199_v22 }
  0x85   : > { %v828_v35 = vpop.eup %827  ;;  %v309_v37 = vsel %vm301_vm3, %v822_v15, %v305_v17  ;;  %v333_v38 = vmul.f32 0.6931472, %v826_v29  ;;  %v368_v21 = vmul.f32 %v308_v1, %v1214_v32  ;;  %v364_v3 = vadd.f32 %v308_v1, %v1214_v32 }
  0x86   : > { %v830_v41 = vpop.eup %829  ;;  %v342_v42 = vmul.f32 0.6931472, %v828_v35  ;;  %v369_v44 = vmul.f32 %v309_v37, %v1217_v33  ;;  %v365_v4 = vadd.f32 %v309_v37, %v1217_v33  ;;  %v370_v46 = vmul.f32 2.0, %v366_v28 }
  0x87   : > { %v351_v26 = vmul.f32 0.6931472, %v830_v41  ;;  %v330_v19 = vsel %vm1259_vm4, %v327_v12, %v324_v30  ;;  %v371_v47 = vmul.f32 2.0, %v367_v34  ;;  %v372_v50 = vmul.f32 2.0, %v368_v21 }
  0x88   : > { %v339_v22 = vsel %vm1266_vm5, %v336_v13, %v333_v38  ;;  %v348_v32 = vsel %vm1273_vm6, %v345_v27, %v342_v42  ;;  %v373_v53 = vmul.f32 2.0, %v369_v44  ;;  %v374_v54 = vsub.f32 %v362_v2, %v370_v46 }
  0x89   : > { %v357_v55 = vsel %vm1294_vm7, %v354_v31, %v351_v26  ;;  %v375_v33 = vsub.f32 %v363_v43, %v371_v47  ;;  %v376_v56 = vsub.f32 %v364_v3, %v372_v50  ;;  %v358_v61 = vadd.f32 %v330_v19, %v1229_v39 }
  0x8a   : > { %v377_v5 = vsub.f32 %v365_v4, %v373_v53  ;;  %v378_v6 = vmul.f32 %v374_v54, %v374_v54  ;;  %v359_v7 = vadd.f32 %v339_v22, %v1232_v40  ;;  %v360_v8 = vadd.f32 %v348_v32, %v1242_v49 }
  0x8b   : > { %v379_v10 = vmul.f32 %v375_v33, %v375_v33  ;;  %v380_v11 = vmul.f32 %v376_v56, %v376_v56  ;;  %v361_v12 = vadd.f32 %v357_v55, %v1246_v52  ;;  %v408_v15 = vadd.s32 %v1222_v36, %v403_v9 }
  0x8c   : > { %v381_v13 = vmul.f32 %v377_v5, %v377_v5  ;;  %v390_v14 = vmul.f32 %v1250_v57, %v378_v6  ;;  %vm410_vm9 = vcmp.lt.s32.totalorder %v406_v60, 16 }
  0x8d   : > { %v391_v63 = vmul.f32 %v1252_v58, %v379_v10  ;;  %v392_v39 = vmul.f32 %v1254_v59, %v380_v11  ;;  %vm412_vm11 = vcmp.lt.s32.totalorder %v408_v15, 16 }
  0x8e   : > { %v393_v0 = vmul.f32 %v1256_v62, %v381_v13  ;;  %v394_v40 = vmul.f32 %v390_v14, %v358_v61 }
  0x8f   : > { %v395_v49 = vmul.f32 %v391_v63, %v359_v7  ;;  %v396_v16 = vmul.f32 %v392_v39, %v360_v8 }
  0x90   : > { %v397_v52 = vmul.f32 %v393_v0, %v361_v12  ;;  %v413_v20 = vsel %vm409_vm8, %v394_v40, 0.0 }
  0x91   : > { %v414_v57 = vsel %vm410_vm9, %v395_v49, 0.0  ;;  %v415_v23 = vsel %vm411_vm10, %v396_v16, 0.0 }
  0x92   : > { %v418_v36 = vadd.f32 %v414_v57, %v413_v20  ;;  %v416_v9 = vsel %vm412_vm11, %v397_v52, 0.0 }
  0x94   : > { %v419_v58 = vadd.f32 %v418_v36, %v415_v23 }
  0x96   : > { %v420_v59 = vadd.f32 %v419_v58, %v416_v9 }
  0x98   : > { %v421_v25 = vadd.f32 %v420_v59, %v417_v24 }
  0x9a   : > { %422 = vst [vmem:[%s1168_s7] sm:$0xff] %v421_v25 }
  0x9b PF: > { %p714_p6 = scmp.ge.s32.totalorder %s1014_s14, 0 }
  0x9c   : > { %v1323_v62 = vld [vmem:[%s1153_s3] sm:$0xff] (!%p714_p6)  ;;  %v1326_v17 = vld [vmem:[%s1153_s3 + $0x8] sm:$0xff] (!%p714_p6)  ;;  %v1329_v18 = vld [vmem:[%s1153_s3 + $0x10] sm:$0xff] (!%p714_p6) }
  0x9d   : > { %426 = sbr.rel (%p714_p6) target bundleno = 213 (0xd5), region = 48  ;;  %v1332_v27 = vld [vmem:[%s1153_s3 + $0x18] sm:$0xff] (!%p714_p6)  ;;  %v435_v28 = vand.u32 (!%p714_p6), 2147483647, %v1323_v62  ;;  %v436_v29 = vand.u32 (!%p714_p6), 2147483647, %v1326_v17 }
  0x9e   : > { %v437_v1 = vand.u32 (!%p714_p6), 2147483647, %v1329_v18  ;;  %v438_v30 = vand.u32 (!%p714_p6), 2147483647, %v1332_v27  ;;  %v1344_v46 = vld [vmem:[%s1159_s4] sm:$0xff] (!%p714_p6)  ;;  %v1347_v19 = vld [vmem:[%s1159_s4 + $0x8] sm:$0xff] (!%p714_p6) }
  0x9f   : > { %v439_v31 = vsub.f32 (!%p714_p6), 0.0, %v435_v28  ;;  %v440_v34 = vsub.f32 (!%p714_p6), 0.0, %v436_v29  ;;  %vm463_vm12 = vcmp.ge.f32.partialorder (!%p714_p6), %v1323_v62, 0.0  ;;  %v479_v50 = vmul.f32 (!%p714_p6), %v1344_v46, %v1323_v62  ;;  %v1359_v53 = vld [vmem:[%s1159_s4 + $0x10] sm:$0xff] (!%p714_p6)  ;;  %v1362_v54 = vld [vmem:[%s1159_s4 + $0x18] sm:$0xff] (!%p714_p6) }
  0xa0   : > { %v441_v35 = vsub.f32 (!%p714_p6), 0.0, %v437_v1  ;;  %v442_v37 = vsub.f32 (!%p714_p6), 0.0, %v438_v30  ;;  %v480_v51 = vmul.f32 (!%p714_p6), %v1347_v19, %v1326_v17  ;;  %vm464_vm13 = vcmp.ge.f32.partialorder (!%p714_p6), %v1326_v17, 0.0 }
  0xa1   : > { %v443_v38 = vmul.f32 (!%p714_p6), 1.442695, %v439_v31  ;;  %v445_v2 = vmul.f32 (!%p714_p6), 1.442695, %v440_v34  ;;  %v475_v22 = vmax.f32 (!%p714_p6), %v1323_v62, 0.0  ;;  %v476_v32 = vmax.f32 (!%p714_p6), %v1326_v17, 0.0 }
  0xa2   : > { %v447_v21 = vmul.f32 (!%p714_p6), 1.442695, %v441_v35  ;;  %v449_v41 = vmul.f32 (!%p714_p6), 1.442695, %v442_v37  ;;  %v477_v55 = vmax.f32 (!%p714_p6), %v1329_v18, 0.0  ;;  %v478_v60 = vmax.f32 (!%p714_p6), %v1332_v27, 0.0 }
  0xa3   : > { %831 = vpow2.f32 (!%p714_p6), %v443_v38  ;;  %v481_v61 = vmul.f32 (!%p714_p6), %v1359_v53, %v1329_v18  ;;  %v482_v5 = vmul.f32 (!%p714_p6), %v1362_v54, %v1332_v27  ;;  %vm465_vm14 = vcmp.ge.f32.partialorder (!%p714_p6), %v1329_v18, 0.0 }
  0xa4   : > { %833 = vpow2.f32 %v445_v2  ;;  %vm466_vm15 = vcmp.ge.f32.partialorder %v1332_v27, 0.0  ;;  %v547_v6 = vmul.f32 -0.5, %v1344_v46  ;;  %v548_v8 = vmul.f32 -0.5, %v1347_v19 }
  0xa5   : > { %835 = vpow2.f32 %v447_v21  ;;  %v1375_v10 = vsub.f32 %v475_v22, %v479_v50  ;;  %v1377_v14 = vsub.f32 %v476_v32, %v480_v51  ;;  %v1379_v15 = vsub.f32 %v477_v55, %v481_v61 }
  0xa6   : > { %837 = vpow2.f32 %v449_v41  ;;  %v1381_v63 = vsub.f32 %v478_v60, %v482_v5  ;;  %v549_v49 = vmul.f32 -0.5, %v1359_v53  ;;  %v550_v16 = vmul.f32 -0.5, %v1362_v54 }
  0xa7   : > { %v551_v52 = vadd.f32 0.75, %v547_v6  ;;  %v552_v9 = vadd.f32 0.75, %v548_v8 }
  0xa8   : > { %v554_v8 = vadd.f32 0.75, %v550_v16 }
  0xad   : > { %v832_v42 = vpop.eup %831 }
  0xae   : > { %v834_v43 = vpop.eup %833  ;;  %v451_v3 = vadd.f32 1.0, %v832_v42  ;;  %v490_v33 = vmul.f32 -0.5, %v832_v42  ;;  %v493_v48 = vand.u32 2147483647, %v832_v42 }
  0xaf   : > { %v1338_v44 = vpop.eup %835  ;;  %v452_v26 = vadd.f32 1.0, %v834_v43  ;;  %v499_v56 = vmul.f32 -0.5, %v834_v43  ;;  %v502_v13 = vand.u32 2147483647, %v834_v43 }
  0xb0   : > { %v1340_v45 = vpop.eup %837  ;;  %v453_v4 = vadd.f32 1.0, %v1338_v44  ;;  %839 = vrcp.f32 %v451_v3  ;;  %v508_v7 = vmul.f32 -0.5, %v1338_v44  ;;  %v491_v11 = vadd.f32 1.0, %v490_v33 }
  0xb1   : > { %v454_v47 = vadd.f32 1.0, %v1340_v45  ;;  %841 = vrcp.f32 %v452_v26  ;;  %v500_v12 = vadd.f32 1.0, %v499_v56  ;;  %v511_v39 = vand.u32 2147483647, %v1338_v44 }
  0xb2   : > { %843 = vrcp.f32 %v453_v4  ;;  %v517_v40 = vmul.f32 -0.5, %v1340_v45  ;;  %vm1387_vm0 = vcmp.lt.f32.partialorder %v493_v48, 0.0004427343  ;;  %v509_v36 = vadd.f32 1.0, %v508_v7 }
  0xb3   : > { %845 = vrcp.f32 %v454_v47  ;;  %v492_v59 = vmul.f32 %v832_v42, %v491_v11  ;;  %v501_v25 = vmul.f32 %v834_v43, %v500_v12  ;;  %vm1391_vm1 = vcmp.lt.f32.partialorder %v502_v13, 0.0004427343 }
  0xb4   : > { %847 = vlog2.f32 %v451_v3  ;;  %vm1398_vm2 = vcmp.lt.f32.partialorder %v511_v39, 0.0004427343  ;;  %v520_v34 = vand.u32 2147483647, %v1340_v45  ;;  %v518_v2 = vadd.f32 1.0, %v517_v40 }
  0xb5   : > { %849 = vlog2.f32 %v452_v26  ;;  %v553_v7 = vadd.f32 0.75, %v549_v49 }
  0xb6   : > { %851 = vlog2.f32 %v453_v4  ;;  %v519_v33 = vmul.f32 %v1340_v45, %v518_v2  ;;  %vm1422_vm3 = vcmp.lt.f32.partialorder %v520_v34, 0.0004427343 }
  0xb7   : > { %853 = vlog2.f32 %v454_v47 }
  0xba   : > { %v840_v0 = vpop.eup %839 }
  0xbb   : > { %v842_v20 = vpop.eup %841  ;;  %v467_v57 = vmul.f32 %v840_v0, %v832_v42 }
  0xbc   : > { %v844_v58 = vpop.eup %843  ;;  %v468_v24 = vmul.f32 %v842_v20, %v834_v43  ;;  %v510_v43 = vmul.f32 %v1338_v44, %v509_v36 }
  0xbd   : > { %v846_v29 = vpop.eup %845  ;;  %v469_v1 = vmul.f32 %v844_v58, %v1338_v44  ;;  %v471_v30 = vsel %vm463_vm12, %v840_v0, %v467_v57 }
  0xbe   : > { %v848_v35 = vpop.eup %847  ;;  %v470_v37 = vmul.f32 %v846_v29, %v1340_v45  ;;  %v472_v38 = vsel %vm464_vm13, %v842_v20, %v468_v24  ;;  %v531_v21 = vmul.f32 %v471_v30, %v1344_v46  ;;  %v527_v17 = vadd.f32 %v471_v30, %v1344_v46 }
  0xbf   : > { %v850_v41 = vpop.eup %849  ;;  %v473_v62 = vsel %vm465_vm14, %v844_v58, %v469_v1  ;;  %v489_v42 = vmul.f32 0.6931472, %v848_v35  ;;  %v532_v3 = vmul.f32 %v472_v38, %v1347_v19  ;;  %v528_v32 = vadd.f32 %v472_v38, %v1347_v19 }
  0xc0   : > { %v852_v26 = vpop.eup %851  ;;  %v474_v4 = vsel %vm466_vm15, %v846_v29, %v470_v37  ;;  %v498_v47 = vmul.f32 0.6931472, %v850_v41  ;;  %v533_v50 = vmul.f32 %v473_v62, %v1359_v53  ;;  %v529_v18 = vadd.f32 %v473_v62, %v1359_v53 }
  0xc1   : > { %v854_v51 = vpop.eup %853  ;;  %v507_v22 = vmul.f32 0.6931472, %v852_v26  ;;  %v534_v55 = vmul.f32 %v474_v4, %v1362_v54  ;;  %v530_v56 = vadd.f32 %v474_v4, %v1362_v54  ;;  %v535_v27 = vmul.f32 2.0, %v531_v21 }
  0xc2   : > { %v516_v44 = vmul.f32 0.6931472, %v854_v51  ;;  %v495_v60 = vsel %vm1387_vm0, %v492_v59, %v489_v42  ;;  %v536_v61 = vmul.f32 2.0, %v532_v3  ;;  %v537_v5 = vmul.f32 2.0, %v533_v50 }
  0xc3   : > { %v504_v19 = vsel %vm1391_vm1, %v501_v25, %v498_v47  ;;  %v513_v53 = vsel %vm1398_vm2, %v510_v43, %v507_v22  ;;  %v538_v6 = vmul.f32 2.0, %v534_v55  ;;  %v539_v45 = vsub.f32 %v527_v17, %v535_v27 }
  0xc4   : > { %v540_v48 = vsub.f32 %v528_v32, %v536_v61  ;;  %v541_v54 = vsub.f32 %v529_v18, %v537_v5  ;;  %v522_v11 = vsel %vm1422_vm3, %v519_v33, %v516_v44  ;;  %v523_v12 = vadd.f32 %v495_v60, %v1375_v10 }
  0xc5   : > { %v542_v13 = vsub.f32 %v530_v56, %v538_v6  ;;  %v543_v39 = vmul.f32 %v539_v45, %v539_v45  ;;  %v524_v0 = vadd.f32 %v504_v19, %v1377_v14  ;;  %v525_v40 = vadd.f32 %v513_v53, %v1379_v15  ;;  %v563_v14 = vld [vmem:[%s1168_s7] sm:$0xff] }
  0xc6   : > { %v544_v20 = vmul.f32 %v540_v48, %v540_v48  ;;  %v545_v57 = vmul.f32 %v541_v54, %v541_v54  ;;  %v526_v49 = vadd.f32 %v522_v11, %v1381_v63 }
  0xc7   : > { %v546_v23 = vmul.f32 %v542_v13, %v542_v13  ;;  %v555_v36 = vmul.f32 %v551_v52, %v543_v39 }
  0xc8   : > { %v556_v16 = vmul.f32 %v552_v9, %v544_v20  ;;  %v557_v58 = vmul.f32 %v553_v7, %v545_v57 }
  0xc9   : > { %v558_v24 = vmul.f32 %v554_v8, %v546_v23  ;;  %v559_v59 = vmul.f32 %v555_v36, %v523_v12 }
  0xca   : > { %v560_v25 = vmul.f32 %v556_v16, %v524_v0  ;;  %v561_v10 = vmul.f32 %v557_v58, %v525_v40 }
  0xcb   : > { %v562_v28 = vmul.f32 %v558_v24, %v526_v49 }
  0xcc   : > { %v564_v29 = vadd.f32 %v560_v25, %v559_v59 }
  0xce   : > { %v565_v1 = vadd.f32 %v564_v29, %v561_v10 }
  0xd0   : > { %v566_v30 = vadd.f32 %v565_v1, %v562_v28 }
  0xd2   : > { %v567_v31 = vadd.f32 %v566_v30, %v563_v14 }
  0xd4   : > { %568 = vst [vmem:[%s1168_s7] sm:$0xff] %v567_v31 }
  0xd5 PF: > { %s716_s8 = sshll.u32 %s1014_s14, 7  ;;  %s589_s17 = sshll.u32 %s1168_s7, 4  ;;  %s1446_s17 = int_to_ptr.vmem [resolvable:$true] %s589_s17 }
  0xd6   : > { %s1443_s12 = scalar_lea.hbm %s1502_s2, %s716_s8  ;;  %s576_s18 = scalar_lea.sflag [#allocation4], %s237_s5 }
  0xd7   : > { %s911_s22 = scalar_lea.vmem %s1446_s17, 128  ;;  %s1031_s14 = smov [#allocation7]  }
  0xd8   : > { %p912_p3 = scmp.ne.s32.totalorder %s1446_s17, %s911_s22  ;;  %s915_s23 = sshll.u32 %s1031_s14, 4  ;;  %s916_s23 = int_to_ptr.vmem [resolvable:$false] %s915_s23 }
  0xd9   : > { %s917_s27 = scalar_lea.vmem %s916_s23, 256  ;;  %p918_p7 = scmp.lt.s32.totalorder %s1446_s17, %s916_s23 }
  0xda   : > { %p913_p5 = pnand %p912_p3, %p1111_p12  ;;  %p919_p8 = scmp.lt.s32.totalorder %s917_s27, %s911_s22 }
  0xdb   : > { %v572_v15 = vld [vmem:[%s1168_s7] sm:$0xff] }
  0xdc   : > { %v573_v63 = vmul.f32 0.00048828125, %v572_v15  ;;  %p914_p4 = pneg %p913_p5  ;;  %p920_p9 = por %p919_p8, %p918_p7 }
  0xde   : > { %574 = vst [vmem:[%s1168_s7] sm:$0xff] %v573_v63  ;;  %p921_p10 = pnand %p920_p9, %p914_p4 }
  0xe0   : > { %924 = shalt.err (!%p921_p10)
}
  0xe1   : > { %s925_s30 = scalar_lea.hbm %s1443_s12, 128  ;;  %s929_s4 = scalar_lea.hbm %s1502_s2, 256 }
  0xe2   : > { %p926_p11 = scmp.ne.s32.totalorder %s1443_s12, %s925_s30  ;;  %p930_p2 = scmp.lt.u32.totalorder %s1443_s12, %s1502_s2 }
  0xe3   : > { %p931_p6 = scmp.lt.u32.totalorder %s929_s4, %s925_s30  ;;  %p933_p5 = scmp.lt.u32.totalorder %s925_s30, %s1443_s12 }
  0xe4   : > { %p927_p0 = pnand %p926_p11, %p1111_p12 }
  0xe5   : > { %p932_p3 = por %p931_p6, %p930_p2 }
  0xe6   : > { %p928_p1 = pneg %p927_p0 }
  0xe7   : > { %p934_p4 = por %p933_p5, %p932_p3 }
  0xe9   : > { %p935_p7 = pnand %p934_p4, %p928_p1 }
  0xeb   : > { %938 = shalt.err (!%p935_p7)
}
  0xec   : > { %723 = dma.vmem_to_hbm [thread:$0]  (%p1111_p12), %s1446_s17, 128, %s1443_s12, %s576_s18  }
  0xed PF: > { %s601_s7 = sand.u32 1, %s994_s9   ;;  %p1524_p8 = scmp.ge.s32.totalorder %s1022_s16, 2 }
  0xee   : > { %s602_s21 = scalar_lea.sflag [#allocation4], %s601_s7 }
  0xef   : > { %p726_p9 = pnand %p1524_p8, %p1115_p13 }
  0xf1   : > { %984 = dma.done.wait (!%p726_p9), %s602_s21, 128  }
  0xf2   : > { %986 = vsyncadd (!%p726_p9), %s602_s21, 4294967168  ;;  %s21_s16 = sadd.s32 1, %s1022_s16   ;;  %s1525_s9 = smov %s998_s10 }
  0xf3   : > { %p18_p10 = scmp.ge.s32.totalorder %s21_s16, 4   ;;  %s1526_s10 = smov %s1002_s11 }
  0xf4   : > { %s1527_s11 = smov %s1105_s24  ;;  %s1528_s12 = smov %s1010_s13 }
  0xf5   : > { %s1490_s13 = smov 0   ;;  %s1529_s14 = smov %s1018_s15 }
  0xf6   : > { %s1530_s15 = smov %s1532_s19  ;;  %20 = sbr.rel (!%p18_p10) target bundleno = 9 (0x9), region = 102 }
  0xfd   :  { %607 = vsyncpa [#allocation3], 1 }
  0xfe   :  { %609 = vsyncpa [#allocation3 + $0x1], 1 }
  0xff   :  { %610 = vsyncpa [#allocation6], 1 }
 0x100   :  { %612 = vsyncpa [#allocation6 + $0x1], 1 }
 0x101   :  { %613 = vsyncpa [#allocation4], 1 }
 0x102   :  { %615 = vsyncpa [#allocation4 + $0x1], 1 }

</bundles_post_ra>
